<compile_context>
chip_gen: v7x
topology: tpu7x:2x2x1
jax: 0.10.0
libtpu: 0.0.40
codegen_flags: <defaults>
</compile_context>

<pallas_src>
import functools

import jax
import jax.numpy as jnp
from jax.experimental import pallas as pl
from jax.experimental.pallas import tpu as pltpu

BN_EPS = 1e-08  # matches nn.BatchNorm1d(latent_dim, eps=1e-08)


def _pad8(n):
    return ((n + 7) // 8) * 8


def _slab_layout(dist_dim, inter_dim, latent_dim):
    """Row offsets (all multiples of 8 -> free sublane-aligned views) for the
    single packed parameter slab, plus its total rows and lane width."""
    off = {}
    r = 0
    off["w_h"] = r;   r += _pad8(dist_dim)      # fc_h weight        (D, I)
    off["w_mu"] = r;  r += _pad8(inter_dim)     # fc_mu weight       (I, L)
    off["w_var"] = r; r += _pad8(inter_dim)     # fc_var weight      (I, L)
    off["w_dh"] = r;  r += _pad8(latent_dim)    # decoder_h weight   (L, I)
    off["w_dm"] = r;  r += _pad8(inter_dim)     # decoder_mean weight(I, D)
    off["bias"] = r;  r += 8                    # 7 bias/affine rows, pad to 8
    width = ((max(dist_dim, inter_dim, latent_dim, 1) + 127) // 128) * 128
    return off, r, width


def _topic_vae_kernel(e1_ref, e2_ref, eps_ref, slab_ref,
                      z1_ref, z2_ref, loss_ref,
                      *, n, dist, inter, latent, off, apply_bn):
    # ---- static, sublane-aligned views into the resident parameter slab ----
    w_h = slab_ref[off["w_h"]:off["w_h"] + dist, :inter]          # (D, I)
    w_mu = slab_ref[off["w_mu"]:off["w_mu"] + inter, :latent]     # (I, L)
    w_var = slab_ref[off["w_var"]:off["w_var"] + inter, :latent]  # (I, L)
    w_dh = slab_ref[off["w_dh"]:off["w_dh"] + latent, :inter]     # (L, I)
    w_dm = slab_ref[off["w_dm"]:off["w_dm"] + inter, :dist]       # (I, D)
    b = off["bias"]
    b_h = slab_ref[b + 0:b + 1, :inter]                           # (1, I)
    b_mu = slab_ref[b + 1:b + 2, :latent]                         # (1, L)
    b_var = slab_ref[b + 2:b + 3, :latent]                        # (1, L)
    gamma = slab_ref[b + 3:b + 4, :latent]                        # (1, L)
    beta = slab_ref[b + 4:b + 5, :latent]                         # (1, L)
    b_dh = slab_ref[b + 5:b + 6, :inter]                          # (1, I)
    b_dm = slab_ref[b + 6:b + 7, :dist]                           # (1, D)

    # ---- stack both entities along rows: every matmul runs once ----
    x = jnp.concatenate([e1_ref[...], e2_ref[...]], axis=0)       # (2N, D)

    # ---- encoder: fc_h -> ReLU ----
    h = jnp.dot(x, w_h, preferred_element_type=jnp.float32) + b_h
    h = jnp.maximum(h, 0.0)                                       # (2N, I)

    # ---- fc_mu / fc_var heads ----
    mu = jnp.dot(h, w_mu, preferred_element_type=jnp.float32) + b_mu        # (2N, L)
    logvar = jnp.dot(h, w_var, preferred_element_type=jnp.float32) + b_var  # (2N, L)

    # ---- BatchNorm1d (training mode, biased batch stats), per entity ----
    if apply_bn:
        def _bn(m):
            mean = jnp.mean(m, axis=0, keepdims=True)
            var = jnp.mean((m - mean) ** 2, axis=0, keepdims=True)
            return (m - mean) * jax.lax.rsqrt(var + BN_EPS) * gamma + beta
        mu = jnp.concatenate([_bn(mu[:n]), _bn(mu[n:])], axis=0)
    # TODO(synk): BatchNorm1d running_mean/running_var side-effect updates are
    # not tracked (forward outputs do not depend on them in training mode).

    # ---- reparameterize: z = eps * exp(0.5*logvar) + mu_bn ----
    std = jnp.exp(0.5 * logvar)
    z = eps_ref[...] * std + mu                                   # (2N, L)
    z1_ref[...] = z[:n]
    z2_ref[...] = z[n:]

    # ---- decoder: fc -> ReLU -> fc -> Sigmoid ----
    dh = jnp.dot(z, w_dh, preferred_element_type=jnp.float32) + b_dh
    dh = jnp.maximum(dh, 0.0)                                     # (2N, I)
    logits = jnp.dot(dh, w_dm, preferred_element_type=jnp.float32) + b_dm
    recon = jax.nn.sigmoid(logits)                                # (2N, D)

    # ---- losses (batch_mask=None branch: all rows active), finalized here ----
    sq_err = (recon - x) ** 2
    mse1 = jnp.mean(sq_err[:n])                                   # F.mse_loss, e1
    mse2 = jnp.mean(sq_err[n:])                                   # F.mse_loss, e2
    # exp(logvar) == std*std (reuses the EUP result computed above)
    kld_rows = -0.5 * jnp.sum(1.0 + logvar - mu * mu - std * std,
                              axis=1, keepdims=True)              # (2N, 1)
    kld1 = jnp.mean(kld_rows[:n])
    kld2 = jnp.mean(kld_rows[n:])
    loss_ref[0, 0] = 0.5 * (mse1 + kld1) + 0.5 * (mse2 + kld2)
    # TODO(synk): batch_mask != None path (masked rows for MSE/KLD/BN stats) is
    # not implemented; the reference forward is exercised with batch_mask=None.


@functools.partial(jax.jit, static_argnames=("dist_dim", "inter_dim", "latent_dim"))
def topic_model_forward(params_slab, batch_e1_inputs, batch_e2_inputs, eps,
                        *, dist_dim, inter_dim, latent_dim):
    """Equivalent of SimpleTopicModelwithBN.forward(e1, e2, batch_mask=None)."""
    B, S, D = batch_e1_inputs.shape
    N = B * S
    off, _, _ = _slab_layout(dist_dim, inter_dim, latent_dim)

    # Row-major reshapes are free (no HBM round trip, unlike the old stack).
    e1 = batch_e1_inputs.reshape(N, D).astype(jnp.float32)
    e2 = batch_e2_inputs.reshape(N, D).astype(jnp.float32)
    eps = eps.astype(jnp.float32)

    kernel = functools.partial(
        _topic_vae_kernel, n=N, dist=dist_dim, inter=inter_dim,
        latent=latent_dim, off=off, apply_bn=N > 1)

    z1, z2, loss = pl.pallas_call(
        kernel,
        out_shape=(
            jax.ShapeDtypeStruct((N, latent_dim), jnp.float32),   # z_e1
            jax.ShapeDtypeStruct((N, latent_dim), jnp.float32),   # z_e2
            jax.ShapeDtypeStruct((1, 1), jnp.float32),            # scalar loss
        ),
        in_specs=[
            pl.BlockSpec(memory_space=pltpu.MemorySpace.VMEM),    # e1 rows
            pl.BlockSpec(memory_space=pltpu.MemorySpace.VMEM),    # e2 rows
            pl.BlockSpec(memory_space=pltpu.MemorySpace.VMEM),    # eps
            pl.BlockSpec(memory_space=pltpu.MemorySpace.VMEM),    # packed params
        ],
        out_specs=(
            pl.BlockSpec(memory_space=pltpu.MemorySpace.VMEM),
            pl.BlockSpec(memory_space=pltpu.MemorySpace.VMEM),
            pl.BlockSpec(memory_space=pltpu.MemorySpace.SMEM),
        ),
    )(e1, e2, eps, params_slab)

    return (loss[0, 0],
            z1.reshape(B, S, latent_dim),
            z2.reshape(B, S, latent_dim))


def init_params(key, dist_dim, inter_dim, topic_dim):
    """Init mimicking torch.nn.Linear defaults, emitted directly into the single
    packed slab layout (weights stored as (in, out), i.e. W.T of nn.Linear)."""
    def linear(k, fan_in, fan_out):
        kw, kb = jax.random.split(k)
        bound = 1.0 / jnp.sqrt(float(fan_in))
        w = jax.random.uniform(kw, (fan_in, fan_out), jnp.float32, -bound, bound)
        bb = jax.random.uniform(kb, (fan_out,), jnp.float32, -bound, bound)
        return w, bb

    keys = jax.random.split(key, 5)
    w_h, b_h = linear(keys[0], dist_dim, inter_dim)
    w_mu, b_mu = linear(keys[1], inter_dim, topic_dim)
    w_var, b_var = linear(keys[2], inter_dim, topic_dim)
    w_dh, b_dh = linear(keys[3], topic_dim, inter_dim)
    w_dm, b_dm = linear(keys[4], inter_dim, dist_dim)

    off, rows, width = _slab_layout(dist_dim, inter_dim, topic_dim)
    slab = jnp.zeros((rows, width), jnp.float32)
    slab = slab.at[off["w_h"]:off["w_h"] + dist_dim, :inter_dim].set(w_h)
    slab = slab.at[off["w_mu"]:off["w_mu"] + inter_dim, :topic_dim].set(w_mu)
    slab = slab.at[off["w_var"]:off["w_var"] + inter_dim, :topic_dim].set(w_var)
    slab = slab.at[off["w_dh"]:off["w_dh"] + topic_dim, :inter_dim].set(w_dh)
    slab = slab.at[off["w_dm"]:off["w_dm"] + inter_dim, :dist_dim].set(w_dm)
    b = off["bias"]
    slab = slab.at[b + 0, :inter_dim].set(b_h)
    slab = slab.at[b + 1, :topic_dim].set(b_mu)
    slab = slab.at[b + 2, :topic_dim].set(b_var)
    slab = slab.at[b + 3, :topic_dim].set(1.0)   # BN gamma
    # BN beta (row b+4) stays 0
    slab = slab.at[b + 5, :inter_dim].set(b_dh)
    slab = slab.at[b + 6, :dist_dim].set(b_dm)
    return slab


if __name__ == "__main__":
    # args.batch_size=2, args.dist_dim=32, args.topic_dim=16, args.topic_inter_map=24
    batch_size, seq_len = 2, 8
    dist_dim, topic_dim, inter_dim = 32, 16, 24

    root = jax.random.PRNGKey(0)
    k_params, k_x1, k_x2, k_eps = jax.random.split(root, 4)

    params_slab = init_params(k_params, dist_dim, inter_dim, topic_dim)
    batch_e1 = jax.random.uniform(k_x1, (batch_size, seq_len, dist_dim), jnp.float32)
    batch_e2 = jax.random.uniform(k_x2, (batch_size, seq_len, dist_dim), jnp.float32)
    # eps ~ N(0,1): torch.randn_like equivalent (distribution-equal, not bitwise).
    eps = jax.random.normal(k_eps, (2 * batch_size * seq_len, topic_dim), jnp.float32)

    loss, z_e1, z_e2 = topic_model_forward(
        params_slab, batch_e1, batch_e2, eps,
        dist_dim=dist_dim, inter_dim=inter_dim, latent_dim=topic_dim)
    jax.block_until_ready((loss, z_e1, z_e2))

    assert loss.shape == ()
    assert z_e1.shape == (batch_size, seq_len, topic_dim)
    assert z_e2.shape == (batch_size, seq_len, topic_dim)
    assert bool(jnp.isfinite(loss))
    print("KERNEL_OK")
</pallas_src>

<mosaic_0001>
module attributes {stable_mosaic.version = 11 : i64} {
  func.func @_topic_vae_kernel(%arg0: memref<16x32xf32, #tpu.memory_space<vmem>>, %arg1: memref<16x32xf32, #tpu.memory_space<vmem>>, %arg2: memref<32x16xf32, #tpu.memory_space<vmem>>, %arg3: memref<128x128xf32, #tpu.memory_space<vmem>>, %arg4: memref<16x16xf32, #tpu.memory_space<vmem>>, %arg5: memref<16x16xf32, #tpu.memory_space<vmem>>, %arg6: memref<1x1xf32, #tpu.memory_space<smem>>) attributes {dimension_semantics = [], scalar_prefetch = 0 : i64, scratch_operands = 0 : i64, tpu.core_type = #tpu.core_type<tc>} {
    %c0 = arith.constant 0 : index
    %c0_0 = arith.constant 0 : index
    %0 = vector.load %arg3[%c0, %c0_0] : memref<128x128xf32, #tpu.memory_space<vmem>>, vector<32x24xf32>
    %c32 = arith.constant 32 : index
    %c0_1 = arith.constant 0 : index
    %1 = vector.load %arg3[%c32, %c0_1] : memref<128x128xf32, #tpu.memory_space<vmem>>, vector<24x16xf32>
    %c56 = arith.constant 56 : index
    %c0_2 = arith.constant 0 : index
    %2 = vector.load %arg3[%c56, %c0_2] : memref<128x128xf32, #tpu.memory_space<vmem>>, vector<24x16xf32>
    %c80 = arith.constant 80 : index
    %c0_3 = arith.constant 0 : index
    %3 = vector.load %arg3[%c80, %c0_3] : memref<128x128xf32, #tpu.memory_space<vmem>>, vector<16x24xf32>
    %c96 = arith.constant 96 : index
    %c0_4 = arith.constant 0 : index
    %4 = vector.load %arg3[%c96, %c0_4] : memref<128x128xf32, #tpu.memory_space<vmem>>, vector<24x32xf32>
    %c120 = arith.constant 120 : index
    %c0_5 = arith.constant 0 : index
    %5 = vector.load %arg3[%c120, %c0_5] : memref<128x128xf32, #tpu.memory_space<vmem>>, vector<1x24xf32>
    %c121 = arith.constant 121 : index
    %c0_6 = arith.constant 0 : index
    %6 = vector.load %arg3[%c121, %c0_6] : memref<128x128xf32, #tpu.memory_space<vmem>>, vector<1x16xf32>
    %c122 = arith.constant 122 : index
    %c0_7 = arith.constant 0 : index
    %7 = vector.load %arg3[%c122, %c0_7] : memref<128x128xf32, #tpu.memory_space<vmem>>, vector<1x16xf32>
    %c123 = arith.constant 123 : index
    %c0_8 = arith.constant 0 : index
    %8 = vector.load %arg3[%c123, %c0_8] : memref<128x128xf32, #tpu.memory_space<vmem>>, vector<1x16xf32>
    %c124 = arith.constant 124 : index
    %c0_9 = arith.constant 0 : index
    %9 = vector.load %arg3[%c124, %c0_9] : memref<128x128xf32, #tpu.memory_space<vmem>>, vector<1x16xf32>
    %c125 = arith.constant 125 : index
    %c0_10 = arith.constant 0 : index
    %10 = vector.load %arg3[%c125, %c0_10] : memref<128x128xf32, #tpu.memory_space<vmem>>, vector<1x24xf32>
    %c126 = arith.constant 126 : index
    %c0_11 = arith.constant 0 : index
    %11 = vector.load %arg3[%c126, %c0_11] : memref<128x128xf32, #tpu.memory_space<vmem>>, vector<1x32xf32>
    %c0_12 = arith.constant 0 : index
    %c0_13 = arith.constant 0 : index
    %12 = vector.load %arg0[%c0_12, %c0_13] : memref<16x32xf32, #tpu.memory_space<vmem>>, vector<16x32xf32>
    %c0_14 = arith.constant 0 : index
    %c0_15 = arith.constant 0 : index
    %13 = vector.load %arg1[%c0_14, %c0_15] : memref<16x32xf32, #tpu.memory_space<vmem>>, vector<16x32xf32>
    %14 = tpu.concatenate %12, %13 in 0 : vector<16x32xf32>, vector<16x32xf32> -> vector<32x32xf32>
    %cst = arith.constant dense<0.000000e+00> : vector<32x24xf32>
    %15 = tpu.matmul %14, %0, %cst {dimension_numbers = #tpu.dot_dimension_numbers<[1], [0], [0], [1], [0, 0, 1, 1], [], []>} : vector<32x32xf32>, vector<32x24xf32>, vector<32x24xf32> -> vector<32x24xf32>
    %16 = vector.broadcast %5 : vector<1x24xf32> to vector<32x24xf32>
    %17 = arith.addf %15, %16 : vector<32x24xf32>
    %cst_16 = arith.constant 0.000000e+00 : f32
    %18 = vector.broadcast %cst_16 : f32 to vector<32x24xf32>
    %19 = arith.maximumf %17, %18 : vector<32x24xf32>
    %cst_17 = arith.constant dense<0.000000e+00> : vector<32x16xf32>
    %20 = tpu.matmul %19, %1, %cst_17 {dimension_numbers = #tpu.dot_dimension_numbers<[1], [0], [0], [1], [0, 0, 1, 1], [], []>} : vector<32x24xf32>, vector<24x16xf32>, vector<32x16xf32> -> vector<32x16xf32>
    %21 = vector.broadcast %6 : vector<1x16xf32> to vector<32x16xf32>
    %22 = arith.addf %20, %21 : vector<32x16xf32>
    %cst_18 = arith.constant dense<0.000000e+00> : vector<32x16xf32>
    %23 = tpu.matmul %19, %2, %cst_18 {dimension_numbers = #tpu.dot_dimension_numbers<[1], [0], [0], [1], [0, 0, 1, 1], [], []>} : vector<32x24xf32>, vector<24x16xf32>, vector<32x16xf32> -> vector<32x16xf32>
    %24 = vector.broadcast %7 : vector<1x16xf32> to vector<32x16xf32>
    %25 = arith.addf %23, %24 : vector<32x16xf32>
    %26 = vector.extract_strided_slice %22 {offsets = [0, 0], sizes = [16, 16], strides = [1, 1]} : vector<32x16xf32> to vector<16x16xf32>
    %cst_19 = arith.constant dense<0.000000e+00> : vector<16xf32>
    %27 = vector.multi_reduction <add>, %26, %cst_19 [0] : vector<16x16xf32> to vector<16xf32>
    %28 = vector.shape_cast %27 : vector<16xf32> to vector<1x16xf32>
    %cst_20 = arith.constant 1.600000e+01 : f32
    %29 = vector.broadcast %cst_20 : f32 to vector<1x16xf32>
    %30 = arith.divf %28, %29 : vector<1x16xf32>
    %31 = vector.broadcast %30 : vector<1x16xf32> to vector<16x16xf32>
    %32 = arith.subf %26, %31 : vector<16x16xf32>
    %33 = arith.mulf %32, %32 : vector<16x16xf32>
    %cst_21 = arith.constant dense<0.000000e+00> : vector<16xf32>
    %34 = vector.multi_reduction <add>, %33, %cst_21 [0] : vector<16x16xf32> to vector<16xf32>
    %35 = vector.shape_cast %34 : vector<16xf32> to vector<1x16xf32>
    %cst_22 = arith.constant 1.600000e+01 : f32
    %36 = vector.broadcast %cst_22 : f32 to vector<1x16xf32>
    %37 = arith.divf %35, %36 : vector<1x16xf32>
    %38 = vector.broadcast %30 : vector<1x16xf32> to vector<16x16xf32>
    %39 = arith.subf %26, %38 : vector<16x16xf32>
    %cst_23 = arith.constant 9.99999993E-9 : f32
    %40 = vector.broadcast %cst_23 : f32 to vector<1x16xf32>
    %41 = arith.addf %37, %40 : vector<1x16xf32>
    %42 = math.rsqrt %41 : vector<1x16xf32>
    %43 = vector.broadcast %42 : vector<1x16xf32> to vector<16x16xf32>
    %44 = arith.mulf %39, %43 : vector<16x16xf32>
    %45 = vector.broadcast %8 : vector<1x16xf32> to vector<16x16xf32>
    %46 = arith.mulf %44, %45 : vector<16x16xf32>
    %47 = vector.broadcast %9 : vector<1x16xf32> to vector<16x16xf32>
    %48 = arith.addf %46, %47 : vector<16x16xf32>
    %49 = vector.extract_strided_slice %22 {offsets = [16, 0], sizes = [16, 16], strides = [1, 1]} : vector<32x16xf32> to vector<16x16xf32>
    %cst_24 = arith.constant dense<0.000000e+00> : vector<16xf32>
    %50 = vector.multi_reduction <add>, %49, %cst_24 [0] : vector<16x16xf32> to vector<16xf32>
    %51 = vector.shape_cast %50 : vector<16xf32> to vector<1x16xf32>
    %cst_25 = arith.constant 1.600000e+01 : f32
    %52 = vector.broadcast %cst_25 : f32 to vector<1x16xf32>
    %53 = arith.divf %51, %52 : vector<1x16xf32>
    %54 = vector.broadcast %53 : vector<1x16xf32> to vector<16x16xf32>
    %55 = arith.subf %49, %54 : vector<16x16xf32>
    %56 = arith.mulf %55, %55 : vector<16x16xf32>
    %cst_26 = arith.constant dense<0.000000e+00> : vector<16xf32>
    %57 = vector.multi_reduction <add>, %56, %cst_26 [0] : vector<16x16xf32> to vector<16xf32>
    %58 = vector.shape_cast %57 : vector<16xf32> to vector<1x16xf32>
    %cst_27 = arith.constant 1.600000e+01 : f32
    %59 = vector.broadcast %cst_27 : f32 to vector<1x16xf32>
    %60 = arith.divf %58, %59 : vector<1x16xf32>
    %61 = vector.broadcast %53 : vector<1x16xf32> to vector<16x16xf32>
    %62 = arith.subf %49, %61 : vector<16x16xf32>
    %cst_28 = arith.constant 9.99999993E-9 : f32
    %63 = vector.broadcast %cst_28 : f32 to vector<1x16xf32>
    %64 = arith.addf %60, %63 : vector<1x16xf32>
    %65 = math.rsqrt %64 : vector<1x16xf32>
    %66 = vector.broadcast %65 : vector<1x16xf32> to vector<16x16xf32>
    %67 = arith.mulf %62, %66 : vector<16x16xf32>
    %68 = vector.broadcast %8 : vector<1x16xf32> to vector<16x16xf32>
    %69 = arith.mulf %67, %68 : vector<16x16xf32>
    %70 = vector.broadcast %9 : vector<1x16xf32> to vector<16x16xf32>
    %71 = arith.addf %69, %70 : vector<16x16xf32>
    %72 = tpu.concatenate %48, %71 in 0 : vector<16x16xf32>, vector<16x16xf32> -> vector<32x16xf32>
    %cst_29 = arith.constant 5.000000e-01 : f32
    %73 = vector.broadcast %cst_29 : f32 to vector<32x16xf32>
    %74 = arith.mulf %73, %25 : vector<32x16xf32>
    %75 = math.exp %74 : vector<32x16xf32>
    %c0_30 = arith.constant 0 : index
    %c0_31 = arith.constant 0 : index
    %76 = vector.load %arg2[%c0_30, %c0_31] : memref<32x16xf32, #tpu.memory_space<vmem>>, vector<32x16xf32>
    %77 = arith.mulf %76, %75 : vector<32x16xf32>
    %78 = arith.addf %77, %72 : vector<32x16xf32>
    %79 = vector.extract_strided_slice %78 {offsets = [0, 0], sizes = [16, 16], strides = [1, 1]} : vector<32x16xf32> to vector<16x16xf32>
    %c0_32 = arith.constant 0 : index
    %c0_33 = arith.constant 0 : index
    %80 = vector.load %arg4[%c0_32, %c0_33] : memref<16x16xf32, #tpu.memory_space<vmem>>, vector<16x16xf32>
    tpu.vector_store %arg4[%c0_32, %c0_33], %79 {strides = array<i32>} : memref<16x16xf32, #tpu.memory_space<vmem>>, vector<16x16xf32>,
    %81 = vector.extract_strided_slice %78 {offsets = [16, 0], sizes = [16, 16], strides = [1, 1]} : vector<32x16xf32> to vector<16x16xf32>
    %c0_34 = arith.constant 0 : index
    %c0_35 = arith.constant 0 : index
    %82 = vector.load %arg5[%c0_34, %c0_35] : memref<16x16xf32, #tpu.memory_space<vmem>>, vector<16x16xf32>
    tpu.vector_store %arg5[%c0_34, %c0_35], %81 {strides = array<i32>} : memref<16x16xf32, #tpu.memory_space<vmem>>, vector<16x16xf32>,
    %cst_36 = arith.constant dense<0.000000e+00> : vector<32x24xf32>
    %83 = tpu.matmul %78, %3, %cst_36 {dimension_numbers = #tpu.dot_dimension_numbers<[1], [0], [0], [1], [0, 0, 1, 1], [], []>} : vector<32x16xf32>, vector<16x24xf32>, vector<32x24xf32> -> vector<32x24xf32>
    %84 = vector.broadcast %10 : vector<1x24xf32> to vector<32x24xf32>
    %85 = arith.addf %83, %84 : vector<32x24xf32>
    %cst_37 = arith.constant 0.000000e+00 : f32
    %86 = vector.broadcast %cst_37 : f32 to vector<32x24xf32>
    %87 = arith.maximumf %85, %86 : vector<32x24xf32>
    %cst_38 = arith.constant dense<0.000000e+00> : vector<32x32xf32>
    %88 = tpu.matmul %87, %4, %cst_38 {dimension_numbers = #tpu.dot_dimension_numbers<[1], [0], [0], [1], [0, 0, 1, 1], [], []>} : vector<32x24xf32>, vector<24x32xf32>, vector<32x32xf32> -> vector<32x32xf32>
    %89 = vector.broadcast %11 : vector<1x32xf32> to vector<32x32xf32>
    %90 = arith.addf %88, %89 : vector<32x32xf32>
    %91 = arith.negf %90 : vector<32x32xf32>
    %92 = math.exp %91 : vector<32x32xf32>
    %cst_39 = arith.constant 1.000000e+00 : f32
    %93 = vector.broadcast %cst_39 : f32 to vector<32x32xf32>
    %94 = arith.addf %93, %92 : vector<32x32xf32>
    %95 = arith.divf %93, %94 : vector<32x32xf32>
    %96 = arith.subf %95, %14 : vector<32x32xf32>
    %97 = arith.mulf %96, %96 : vector<32x32xf32>
    %98 = vector.extract_strided_slice %97 {offsets = [0, 0], sizes = [16, 32], strides = [1, 1]} : vector<32x32xf32> to vector<16x32xf32>
    %99 = vector.shape_cast %98 : vector<16x32xf32> to vector<1x16x32xf32>
    %cst_40 = arith.constant dense<0.000000e+00> : vector<1xf32>
    %100 = vector.multi_reduction <add>, %99, %cst_40 [1, 2] : vector<1x16x32xf32> to vector<1xf32>
    %101 = vector.shape_cast %100 : vector<1xf32> to vector<1x1x1xf32>
    %102 = vector.extract %101[0, 0, 0] : f32 from vector<1x1x1xf32>
    %cst_41 = arith.constant 5.120000e+02 : f32
    %103 = arith.divf %102, %cst_41 : f32
    %104 = vector.extract_strided_slice %97 {offsets = [16, 0], sizes = [16, 32], strides = [1, 1]} : vector<32x32xf32> to vector<16x32xf32>
    %105 = vector.shape_cast %104 : vector<16x32xf32> to vector<1x16x32xf32>
    %cst_42 = arith.constant dense<0.000000e+00> : vector<1xf32>
    %106 = vector.multi_reduction <add>, %105, %cst_42 [1, 2] : vector<1x16x32xf32> to vector<1xf32>
    %107 = vector.shape_cast %106 : vector<1xf32> to vector<1x1x1xf32>
    %108 = vector.extract %107[0, 0, 0] : f32 from vector<1x1x1xf32>
    %cst_43 = arith.constant 5.120000e+02 : f32
    %109 = arith.divf %108, %cst_43 : f32
    %cst_44 = arith.constant 1.000000e+00 : f32
    %110 = vector.broadcast %cst_44 : f32 to vector<32x16xf32>
    %111 = arith.addf %110, %25 : vector<32x16xf32>
    %112 = arith.mulf %72, %72 : vector<32x16xf32>
    %113 = arith.subf %111, %112 : vector<32x16xf32>
    %114 = arith.mulf %75, %75 : vector<32x16xf32>
    %115 = arith.subf %113, %114 : vector<32x16xf32>
    %cst_45 = arith.constant dense<0.000000e+00> : vector<32xf32>
    %116 = vector.multi_reduction <add>, %115, %cst_45 [1] : vector<32x16xf32> to vector<32xf32>
    %117 = vector.shape_cast %116 : vector<32xf32> to vector<32x1xf32>
    %cst_46 = arith.constant -5.000000e-01 : f32
    %118 = vector.broadcast %cst_46 : f32 to vector<32x1xf32>
    %119 = arith.mulf %118, %117 : vector<32x1xf32>
    %120 = vector.extract_strided_slice %119 {offsets = [0, 0], sizes = [16, 1], strides = [1, 1]} : vector<32x1xf32> to vector<16x1xf32>
    %121 = vector.shape_cast %120 : vector<16x1xf32> to vector<1x16x1xf32>
    %cst_47 = arith.constant dense<0.000000e+00> : vector<1xf32>
    %122 = vector.multi_reduction <add>, %121, %cst_47 [1, 2] : vector<1x16x1xf32> to vector<1xf32>
    %123 = vector.shape_cast %122 : vector<1xf32> to vector<1x1x1xf32>
    %124 = vector.extract %123[0, 0, 0] : f32 from vector<1x1x1xf32>
    %cst_48 = arith.constant 1.600000e+01 : f32
    %125 = arith.divf %124, %cst_48 : f32
    %126 = vector.extract_strided_slice %119 {offsets = [16, 0], sizes = [16, 1], strides = [1, 1]} : vector<32x1xf32> to vector<16x1xf32>
    %127 = vector.shape_cast %126 : vector<16x1xf32> to vector<1x16x1xf32>
    %cst_49 = arith.constant dense<0.000000e+00> : vector<1xf32>
    %128 = vector.multi_reduction <add>, %127, %cst_49 [1, 2] : vector<1x16x1xf32> to vector<1xf32>
    %129 = vector.shape_cast %128 : vector<1xf32> to vector<1x1x1xf32>
    %130 = vector.extract %129[0, 0, 0] : f32 from vector<1x1x1xf32>
    %cst_50 = arith.constant 1.600000e+01 : f32
    %131 = arith.divf %130, %cst_50 : f32
    %132 = arith.addf %103, %125 : f32
    %cst_51 = arith.constant 5.000000e-01 : f32
    %133 = arith.mulf %cst_51, %132 : f32
    %134 = arith.addf %109, %131 : f32
    %cst_52 = arith.constant 5.000000e-01 : f32
    %135 = arith.mulf %cst_52, %134 : f32
    %136 = arith.addf %133, %135 : f32
    %c0_53 = arith.constant 0 : index
    %c0_54 = arith.constant 0 : index
    %137 = memref.load %arg6[%c0_53, %c0_54] : memref<1x1xf32, #tpu.memory_space<smem>>
    memref.store %136, %arg6[%c0_53, %c0_54] : memref<1x1xf32, #tpu.memory_space<smem>>
    return
  }
}

</mosaic_0001>

<bundles_post_ra>
// kernel: topic_model_forward.1
= control target key start
LH: loop header
LB: loop body
LE: loop exit
PB: predicated region body
PF: predicated region fallthrough
CT: control target
= control target key end

     0   :  { %12 = vsyncpa [#allocation3], 0  ;;  %s1315_s0 = inlined_call_operand.vmem [shape: f32[16,32], index: 0, kind: input, shape index: {}]   ;;  %s1316_s1 = inlined_call_operand.vmem [shape: f32[16,32], index: 1, kind: input, shape index: {}]   ;;  %s1317_s2 = inlined_call_operand.vmem [shape: f32[32,16], index: 2, kind: input, shape index: {}]   ;;  %s1318_s3 = inlined_call_operand.hbm [shape: f32[128,128], index: 3, kind: input, shape index: {}]   ;;  %s1319_s4 = inlined_call_operand.hbm [shape: f32[16,16], index: 4, kind: output, shape index: {0}]   ;;  %s1320_s5 = inlined_call_operand.hbm [shape: f32[16,16], index: 5, kind: output, shape index: {1}]   ;;  %s1321_s6 = inlined_call_operand.hbm [shape: f32[1,1], index: 6, kind: output, shape index: {2}]  }
   0x1   :  { %13 = vsyncpa [#allocation4], 0 }
   0x2   :  { %14 = vsyncpa [#allocation8], 0 }
   0x3   :  { %15 = vsyncpa [#allocation5], 0  ;;  %s1130_s21 = smov [#allocation2]   ;;  %s1046_s25 = scalar_lea.hbm %s1318_s3, 2048 }
   0x4   :  { %s27_s22 = sshll.u32 %s1130_s21, 4  ;;  %p1047_p0 = scmp.ne.s32.totalorder %s1318_s3, %s1046_s25  ;;  %s28_s22 = int_to_ptr.vmem [resolvable:$true] %s27_s22 }
   0x5   :  { %p1050_p1 = scmp.lt.u32.totalorder %s1046_s25, %s1318_s3 }
   0x7   :  { %p1052_p2 = pnand %p1050_p1, %p1047_p0 }
   0x9   :  { %1055 = shalt.err (!%p1052_p2)
}
   0xa   :  { %s1056_s30 = scalar_lea.vmem %s28_s22, 2048  ;;  %p1061_p4 = scmp.lt.s32.totalorder %s28_s22, %s28_s22 }
   0xb   :  { %p1057_p3 = scmp.ne.s32.totalorder %s28_s22, %s1056_s30  ;;  %p1062_p5 = scmp.lt.s32.totalorder %s1056_s30, %s1056_s30 }
   0xd   :  { %p1063_p6 = por %p1062_p5, %p1061_p4 }
   0xf   :  { %p1064_p7 = pnand %p1063_p6, %p1057_p3 }
  0x11   :  { %1067 = shalt.err (!%p1064_p7)
}
  0x12   :  { %s1131_s7 = smov 128   ;;  %s1132_s8 = smov 8  }
  0x13   :  { %33 = dma.hbm_to_vmem [thread:$0]  %s1318_s3, 2048, %s28_s22, [#allocation3], %s1131_s7, %s1131_s7, %s1132_s8  }
  0x14   :  { %1122 = dma.done.wait [#allocation3], 2048  }
  0x15   :  { %1123 = vsyncadd [#allocation3], 4294965248  ;;  %vm67_vm0 = vcmask 261120   ;;  %v37_v0 = vld [vmem:[#allocation2] sm:$0xff]  ;;  %v38_v1 = vld [vmem:[#allocation2 + $0x8] sm:$0xff]  ;;  %vm173_vm1 = vcmask 195584  }
  0x16   :  { %v39_v2 = vld [vmem:[#allocation2 + $0x10] sm:$0xff]  ;;  %v976_v3 = vpack.c.bf16 %v38_v1, %v37_v0  ;;  %v40_v4 = vld [vmem:[#allocation2 + $0x18] sm:$0xff]  ;;  %v1189_v5 = vld [vmem:[%s1315_s0] sm:$0xff]  ;;  %vm360_vm2 = vcmask 130048   ;;  %vm766_vm3 = vcmask 7168   ;;  %s1134_s25 = smov [#allocation7]  }
  0x17   :  { %v980_v6 = vpack.c.bf16 %v40_v4, %v39_v2  ;;  %924 = vmatprep.mubr.msk.f32.mxu0 %vm67_vm0, %v1189_v5  ;;  %v1196_v7 = vld [vmem:[%s1315_s0 + $0x8] sm:$0xff]  ;;  %v1201_v8 = vld [vmem:[%s1316_s1] sm:$0xff]  ;;  %v43_v13 = vld [vmem:[#allocation2 + $0x30] sm:$0xff]  ;;  %s821_s26 = sshll.u32 %s1134_s25, 4  ;;  %s1266_s26 = int_to_ptr.vmem [resolvable:$true] %s821_s26 }
  0x18   :  { %977 = vmatprep.subr.bf16.mxu0 %v976_v3  ;;  %v1210_v9 = vld [vmem:[%s1316_s1 + $0x8] sm:$0xff]  ;;  %v41_v10 = vld [vmem:[#allocation2 + $0x20] sm:$0xff]  ;;  %v44_v14 = vld [vmem:[#allocation2 + $0x38] sm:$0xff] }
  0x19   :  { %979 = vmatpush3.bf16.msra.mxu0 %v976_v3  ;;  %v42_v11 = vld [vmem:[#allocation2 + $0x28] sm:$0xff]  ;;  %v45_v15 = vld [vmem:[#allocation2 + $0x40] sm:$0xff]  ;;  %v850_v17 = vld [vmem:[#allocation2 + $0x78] ss:$0 sm:$0xff] }
  0x1a   :  { %981 = vmatprep.subr.bf16.mxu0 %v980_v6  ;;  %v984_v12 = vpack.c.bf16 %v42_v11, %v41_v10  ;;  %v988_v16 = vpack.c.bf16 %v45_v15, %v44_v14  ;;  %v46_v28 = vld [vmem:[#allocation2 + $0x48] sm:$0xff]  ;;  %v47_v31 = vld [vmem:[#allocation2 + $0x50] sm:$0xff]  ;;  %v48_v32 = vld [vmem:[#allocation2 + $0x58] sm:$0xff] }
  0x1b   :  { %v992_v33 = vpack.c.bf16 %v48_v32, %v47_v31  ;;  %v855_v34 = vld [vmem:[#allocation2 + $0x79] ss:$0 sm:$0xff] }
  0x1c   :  { %985 = vmatprep.subr.bf16.mxu1 %v984_v12 }
  0x1d   :  { %983 = vmatpush3.bf16.msra.mxu0 %v980_v6  ;;  %987 = vmatpush3.bf16.msra.mxu1 %v984_v12 }
  0x1e   :  { %934 = vmatprep.subr.mxu1 %v43_v13  ;;  %993 = vmatprep.subr.bf16.mxu0 %v992_v33 }
  0x20   :  { %925 = vmatmul.mubr.msk.f32.vlgmr.msra.gmra.mrb[0].mxu0 %vm67_vm0, %v1196_v7 }
  0x21   :  { %927 = vmatprep.mubr.msk.f32.mxu0 %vm67_vm0, %v1201_v8  ;;  %935 = vmatpush3.msra.mxu1 %v43_v13 }
  0x22   :  { %989 = vmatprep.subr.bf16.mxu1 %v988_v16  ;;  %995 = vmatpush3.bf16.msra.mxu0 %v992_v33 }
  0x24   :  { %928 = vmatmul.mubr.msk.f32.gmra.mrb[2].mxu0 %vm67_vm0, %v1210_v9 }
  0xf3   :  { %v926_v18 = vpop.f32.mrb[0].mxu0 }
  0xf4   :  { %v152_v19 = vadd.f32 %v926_v18, %v850_v17  ;;  %v146_v20 = vpop.f32.mrb[1].mxu0 }
  0xf5   :  { %v147_v21 = vadd.f32 %v850_v17, %v146_v20 }
  0xf6   :  { %v166_v24 = vmax.f32 %v152_v19, 0.0  ;;  %v860_v19 = vld [vmem:[#allocation2 + $0x7a] ss:$0 sm:$0xff] }
  0xf7   :  { %v165_v22 = vmax.f32 %v147_v21, 0.0  ;;  %v929_v23 = vpop.f32.mrb[2].mxu0 }
  0xf8   :  { %v162_v25 = vadd.f32 %v929_v23, %v850_v17  ;;  %v156_v26 = vpop.f32.mrb[3].mxu0 }
  0xf9   :  { %v157_v27 = vadd.f32 %v850_v17, %v156_v26  ;;  %936 = vmatprep.mubr.msk.f32.mxu1 %vm173_vm1, %v165_v22 }
  0xfa   :  { %937 = vmatmul.mubr.msk.f32.vlgmr.msra.gmra.mrb[0].mxu1 %vm173_vm1, %v166_v24  ;;  %v168_v30 = vmax.f32 %v162_v25, 0.0 }
  0xfb   :  { %v167_v29 = vmax.f32 %v157_v27, 0.0  ;;  %991 = vmatpush3.bf16.msra.mxu1 %v988_v16 }
  0xfc   :  { %946 = vmatprep.subr.mxu1 %v46_v28 }
  0xfd   :  { %939 = vmatprep.mubr.msk.f32.mxu1 %vm173_vm1, %v167_v29 }
  0xfe   :  { %940 = vmatmul.mubr.msk.f32.gmra.mrb[2].mxu1 %vm173_vm1, %v168_v30 }
  0xff   :  { %948 = vmatprep.mubr.msk.f32.mxu1 %vm173_vm1, %v165_v22  ;;  %947 = vmatpush3.msra.mxu1 %v46_v28 }
 0x102   :  { %949 = vmatmul.mubr.msk.f32.vlgmr.msra.gmra.mrb[4].mxu1 %vm173_vm1, %v166_v24 }
 0x103   :  { %951 = vmatprep.mubr.msk.f32.mxu1 %vm173_vm1, %v167_v29 }
 0x106   :  { %952 = vmatmul.mubr.msk.f32.gmra.mrb[6].mxu1 %vm173_vm1, %v168_v30 }
 0x1cd   :  { %v938_v35 = vpop.f32.mrb[0].mxu1 }
 0x1ce   :  { %v258_v36 = vadd.f32 %v938_v35, %v855_v34  ;;  %v252_v37 = vpop.f32.mrb[1].mxu1 }
 0x1cf   :  { %v253_v38 = vadd.f32 %v855_v34, %v252_v37 }
 0x1d0   :  { %v362_v39 = vsel %vm360_vm2, %v258_v36, 0.0 }
 0x1d1   :  { %v361_v40 = vsel %vm360_vm2, %v253_v38, 0.0  ;;  %v941_v41 = vpop.f32.mrb[2].mxu1 }
 0x1d2   :  { %v363_v42 = vadd.f32 %v362_v39, %v361_v40  ;;  %v268_v43 = vadd.f32 %v941_v41, %v855_v34  ;;  %v262_v44 = vpop.f32.mrb[3].mxu1 }
 0x1d3   :  { %v263_v45 = vadd.f32 %v855_v34, %v262_v44 }
 0x1d4   :  { %v364_v46 = vrot.slane %v363_v42, 4  ;;  %v403_v47 = vsel %vm360_vm2, %v268_v43, 0.0 }
 0x1d5   :  { %v402_v48 = vsel %vm360_vm2, %v263_v45, 0.0  ;;  %v950_v49 = vpop.f32.mrb[4].mxu1 }
 0x1d6   :  { %v365_v50 = vadd.f32 %v364_v46, %v363_v42  ;;  %v404_v51 = vadd.f32 %v403_v47, %v402_v48  ;;  %v341_v52 = vpop.f32.mrb[5].mxu1  ;;  %v347_v24 = vadd.f32 %v950_v49, %v860_v19 }
 0x1d7   :  { %v342_v27 = vadd.f32 %v860_v19, %v341_v52  ;;  %v865_v52 = vld [vmem:[#allocation2 + $0x7b] ss:$0 sm:$0xff] }
 0x1d8   :  { %v366_v53 = vrot.slane %v365_v50, 2  ;;  %v405_v54 = vrot.slane %v404_v51, 4  ;;  %v435_v30 = vmul.f32 0.5, %v347_v24 }
 0x1d9   :  { %v953_v55 = vpop.f32.mrb[6].mxu1  ;;  %v434_v33 = vmul.f32 0.5, %v342_v27 }
 0x1da   :  { %v367_v56 = vadd.f32 %v366_v53, %v365_v50  ;;  %v406_v57 = vadd.f32 %v405_v54, %v404_v51  ;;  %v351_v58 = vpop.f32.mrb[7].mxu1  ;;  %v357_v34 = vadd.f32 %v953_v55, %v860_v19 }
 0x1db   :  { %v352_v37 = vadd.f32 %v860_v19, %v351_v58  ;;  %v438_v41 = vmul.f32 1.442695, %v434_v33  ;;  %v866_v58 = vld [vmem:[#allocation2 + $0x7c] ss:$0 sm:$0xff] }
 0x1dc   :  { %v368_v59 = vrot.slane %v367_v56, 1  ;;  %v407_v60 = vrot.slane %v406_v57, 2  ;;  %v437_v42 = vmul.f32 0.5, %v357_v34 }
 0x1de   :  { %v369_v61 = vadd.f32 %v368_v59, %v367_v56  ;;  %v408_v62 = vadd.f32 %v407_v60, %v406_v57  ;;  %v444_v47 = vmul.f32 1.442695, %v437_v42  ;;  %v447_v56 = vld [vmem:[%s1317_s2 + $0x8] sm:$0xff]  ;;  %v446_v57 = vld [vmem:[%s1317_s2] sm:$0xff] }
 0x1e0   :  { %v371_v63 = vmul.f32 0.0625, %v369_v61  ;;  %v409_v0 = vrot.slane %v408_v62, 1 }
 0x1e2   :  { %v372_v1 = vsub.f32 %v253_v38, %v371_v63  ;;  %v373_v2 = vsub.f32 %v258_v36, %v371_v63  ;;  %v410_v3 = vadd.f32 %v409_v0, %v408_v62  ;;  %v440_v38 = vmul.f32 1.442695, %v435_v30 }
 0x1e4   :  { %v374_v4 = vmul.f32 %v372_v1, %v372_v1  ;;  %v375_v6 = vmul.f32 %v373_v2, %v373_v2  ;;  %v411_v10 = vmul.f32 0.0625, %v410_v3  ;;  %1018 = vpow2.f32 %v440_v38 }
 0x1e6   :  { %v376_v11 = vsel %vm360_vm2, %v374_v4, 0.0  ;;  %v377_v12 = vsel %vm360_vm2, %v375_v6, 0.0  ;;  %v412_v13 = vsub.f32 %v263_v45, %v411_v10  ;;  %v413_v14 = vsub.f32 %v268_v43, %v411_v10 }
 0x1e7   :  { %v378_v15 = vadd.f32 %v377_v12, %v376_v11  ;;  %v436_v45 = vmul.f32 0.5, %v352_v37  ;;  %v731_v10 = vadd.f32 1.0, %v347_v24  ;;  %v730_v11 = vadd.f32 1.0, %v342_v27  ;;  %v448_v12 = vld [vmem:[%s1317_s2 + $0x10] sm:$0xff] }
 0x1e8   :  { %v414_v16 = vmul.f32 %v412_v13, %v412_v13  ;;  %v415_v17 = vmul.f32 %v413_v14, %v413_v14 }
 0x1e9   :  { %v379_v18 = vrot.slane %v378_v15, 4  ;;  %v442_v49 = vmul.f32 1.442695, %v436_v45 }
 0x1ea   :  { %v416_v20 = vsel %vm360_vm2, %v414_v16, 0.0  ;;  %v417_v21 = vsel %vm360_vm2, %v415_v17, 0.0 }
 0x1eb   :  { %v380_v22 = vadd.f32 %v379_v18, %v378_v15  ;;  %v418_v23 = vadd.f32 %v417_v21, %v416_v20  ;;  %v449_v15 = vld [vmem:[%s1317_s2 + $0x18] sm:$0xff]  ;;  %v733_v20 = vadd.f32 1.0, %v357_v34  ;;  %v732_v21 = vadd.f32 1.0, %v352_v37  ;;  %s1133_s2 = smov [#allocation6]  }
 0x1ec   :  { %s809_s24 = sshll.u32 %s1133_s2, 4  ;;  %s810_s24 = int_to_ptr.vmem [resolvable:$true] %s809_s24 }
 0x1ed   :  { %v381_v25 = vrot.slane %v380_v22, 2  ;;  %v419_v26 = vrot.slane %v418_v23, 4  ;;  %s1068_s27 = scalar_lea.vmem %s810_s24, 256  ;;  %p1073_p9 = scmp.lt.s32.totalorder %s810_s24, %s810_s24 }
 0x1ee   :  { %v1019_v50 = vpop.eup %1018  ;;  %p1069_p8 = scmp.ne.s32.totalorder %s810_s24, %s1068_s27  ;;  %p1074_p10 = scmp.lt.s32.totalorder %s1068_s27, %s1068_s27 }
 0x1ef   :  { %v382_v28 = vadd.f32 %v381_v25, %v380_v22  ;;  %v420_v29 = vadd.f32 %v419_v26, %v418_v23  ;;  %v451_v62 = vmul.f32 %v1019_v50, %v447_v56 }
 0x1f0   :  { %p1075_p11 = por %p1074_p10, %p1073_p9 }
 0x1f1   :  { %v383_v31 = vrot.slane %v382_v28, 1  ;;  %v421_v32 = vrot.slane %v420_v29, 2 }
 0x1f2   :  { %p1076_p12 = pnand %p1075_p11, %p1069_p8 }
 0x1f3   :  { %v384_v35 = vadd.f32 %v383_v31, %v382_v28  ;;  %v422_v36 = vadd.f32 %v421_v32, %v420_v29  ;;  %v743_v29 = vmul.f32 %v1019_v50, %v1019_v50  ;;  %v867_v50 = vld [vmem:[#allocation2 + $0x7d] ss:$0 sm:$0xff] }
 0x1f5   :  { %v385_v39 = vmul.f32 0.0625, %v384_v35  ;;  %v423_v40 = vrot.slane %v422_v36, 1 }
 0x1f7   :  { %v386_v43 = vadd.f32 1e-08, %v385_v39  ;;  %v424_v44 = vadd.f32 %v423_v40, %v422_v36 }
 0x1f9   :  { %1020 = vrsqrt.f32 %v386_v43  ;;  %v425_v46 = vmul.f32 0.0625, %v424_v44 }
 0x1fa   :  { %1022 = vpow2.f32 %v438_v41 }
 0x1fb   :  { %v426_v48 = vadd.f32 1e-08, %v425_v46  ;;  %v49_v46 = vld [vmem:[#allocation2 + $0x60] sm:$0xff] }
 0x1fd   :  { %1024 = vrsqrt.f32 %v426_v48 }
 0x1fe   :  { %1026 = vpow2.f32 %v444_v47  ;;  %v50_v47 = vld [vmem:[#allocation2 + $0x68] sm:$0xff] }
 0x1ff   :  { %1028 = vpow2.f32 %v442_v49  ;;  %v996_v48 = vpack.c.bf16 %v50_v47, %v49_v46  ;;  %v51_v49 = vld [vmem:[#allocation2 + $0x70] sm:$0xff] }
 0x201   :  { %997 = vmatprep.subr.bf16.mxu0 %v996_v48  ;;  %1000 = vmatprep.subr.bf16.mxu1 %v996_v48 }
 0x202   :  { %1002 = vmatpush3.bf16.msra.mxu1 %v996_v48 }
 0x203   :  { %v1021_v51 = vpop.eup %1020  ;;  %1001 = vmatprep.subr.mxu1 %v51_v49 }
 0x204   :  { %v1023_v53 = vpop.eup %1022  ;;  %v388_v54 = vmul.f32 %v1021_v51, %v372_v1  ;;  %v389_v55 = vmul.f32 %v1021_v51, %v373_v2 }
 0x205   :  { %v450_v63 = vmul.f32 %v1023_v53, %v446_v57  ;;  %v742_v27 = vmul.f32 %v1023_v53, %v1023_v53 }
 0x206   :  { %v394_v59 = vmul.f32 %v865_v52, %v388_v54  ;;  %v395_v60 = vmul.f32 %v865_v52, %v389_v55  ;;  %1003 = vmatpush3.msra.mxu1 %v51_v49 }
 0x207   :  { %v1025_v61 = vpop.eup %1024 }
 0x208   :  { %v1027_v0 = vpop.eup %1026  ;;  %v400_v3 = vadd.f32 %v866_v58, %v394_v59  ;;  %v401_v4 = vadd.f32 %v866_v58, %v395_v60  ;;  %v428_v6 = vmul.f32 %v1025_v61, %v412_v13  ;;  %v429_v1 = vmul.f32 %v1025_v61, %v413_v14 }
 0x209   :  { %v1029_v2 = vpop.eup %1028  ;;  %v453_v25 = vmul.f32 %v1027_v0, %v449_v15  ;;  %v745_v39 = vmul.f32 %v1027_v0, %v1027_v0 }
 0x20a   :  { %v430_v16 = vmul.f32 %v865_v52, %v428_v6  ;;  %v431_v17 = vmul.f32 %v865_v52, %v429_v1  ;;  %v455_v18 = vadd.f32 %v451_v62, %v401_v4  ;;  %v454_v19 = vadd.f32 %v450_v63, %v400_v3  ;;  %v872_v63 = vld [vmem:[#allocation2 + $0x7e] ss:$0 sm:$0xff] }
 0x20b   :  { %v734_v22 = vmul.f32 %v400_v3, %v400_v3  ;;  %v735_v13 = vmul.f32 %v401_v4, %v401_v4  ;;  %v452_v23 = vmul.f32 %v1029_v2, %v448_v12  ;;  %v744_v37 = vmul.f32 %v1029_v2, %v1029_v2 }
 0x20c   :  { %v432_v14 = vadd.f32 %v866_v58, %v430_v16  ;;  %459 = vst.msk [vmem:[#allocation6 + $0x8] sm:$0xff] %vm360_vm2, %v455_v18  ;;  %958 = vmatprep.mubr.msk.f32.mxu0 %vm360_vm2, %v454_v19  ;;  %458 = vst.msk [vmem:[#allocation6] sm:$0xff] %vm360_vm2, %v454_v19  ;;  %v433_v24 = vadd.f32 %v866_v58, %v431_v17 }
 0x20d   :  { %959 = vmatmul.mubr.msk.f32.vlgmr.msra.gmra.mrb[4].mxu0 %vm360_vm2, %v455_v18  ;;  %v738_v26 = vsub.f32 %v730_v11, %v734_v22  ;;  %v739_v28 = vsub.f32 %v731_v10, %v735_v13 }
 0x20e   :  { %v456_v30 = vadd.f32 %v452_v23, %v432_v14  ;;  %v457_v31 = vadd.f32 %v453_v25, %v433_v24  ;;  %v736_v32 = vmul.f32 %v432_v14, %v432_v14  ;;  %v737_v33 = vmul.f32 %v433_v24, %v433_v24  ;;  %999 = vmatpush3.bf16.msra.mxu0 %v996_v48 }
 0x20f   :  { %v746_v34 = vsub.f32 %v738_v26, %v742_v27  ;;  %v747_v35 = vsub.f32 %v739_v28, %v743_v29  ;;  %968 = vmatprep.subr.mxu0 %v51_v49 }
 0x210   :  { %961 = vmatprep.mubr.msk.f32.mxu0 %vm360_vm2, %v456_v30  ;;  %460 = vst.msk [vmem:[#allocation7] sm:$0xff] %vm360_vm2, %v456_v30  ;;  %461 = vst.msk [vmem:[#allocation7 + $0x8] sm:$0xff] %vm360_vm2, %v457_v31  ;;  %v740_v36 = vsub.f32 %v732_v21, %v736_v32  ;;  %v741_v38 = vsub.f32 %v733_v20, %v737_v33 }
 0x211   :  { %v750_v40 = vsel %vm360_vm2, %v746_v34, 0.0  ;;  %962 = vmatmul.mubr.msk.f32.gmra.mrb[6].mxu0 %vm360_vm2, %v457_v31  ;;  %v753_v44 = vsel %vm360_vm2, %v747_v35, 0.0 }
 0x212   :  { %751 = vadd.xlane.f32.xlu0 %v750_v40  ;;  %v748_v41 = vsub.f32 %v740_v36, %v744_v37  ;;  %v749_v42 = vsub.f32 %v741_v38, %v745_v39  ;;  %969 = vmatpush3.msra.mxu0 %v51_v49 }
 0x214   :  { %v756_v43 = vsel %vm360_vm2, %v748_v41, 0.0  ;;  %v759_v45 = vsel %vm360_vm2, %v749_v42, 0.0 }
 0x215   :  { %757 = vadd.xlane.f32.xlu1 %v756_v43 }
 0x216   :  { %754 = vadd.xlane.f32.xlu0 %v753_v44 }
 0x219   :  { %760 = vadd.xlane.f32.xlu1 %v759_v45 }
 0x29f   :  { %v752_v24 = vpop.xlane.xlu0 %751 }
 0x2a0   :  { %v762_v39 = vmul.f32 -0.5, %v752_v24 }
 0x2a2   :  { %v758_v25 = vpop.xlane.xlu1 %757  ;;  %v767_v48 = vsel %vm766_vm3, %v762_v39, 0.0 }
 0x2a3   :  { %v755_v28 = vpop.xlane.xlu0 %754  ;;  %v764_v46 = vmul.f32 -0.5, %v758_v25 }
 0x2a4   :  { %v763_v33 = vmul.f32 -0.5, %v755_v28 }
 0x2a6   :  { %v761_v36 = vpop.xlane.xlu1 %760  ;;  %v768_v44 = vsel %vm766_vm3, %v763_v33, 0.0 }
 0x2e0   :  { %v960_v51 = vpop.f32.mrb[4].mxu0 }
 0x2e1   :  { %v550_v52 = vadd.f32 %v960_v51, %v867_v50  ;;  %v544_v53 = vpop.f32.mrb[5].mxu0  ;;  %v782_v51 = vsel %vm766_vm3, %v764_v46, 0.0 }
 0x2e2   :  { %v545_v54 = vadd.f32 %v867_v50, %v544_v53 }
 0x2e3   :  { %v564_v57 = vmax.f32 %v550_v52, 0.0 }
 0x2e4   :  { %v563_v55 = vmax.f32 %v545_v54, 0.0  ;;  %v963_v56 = vpop.f32.mrb[6].mxu0 }
 0x2e5   :  { %v560_v58 = vadd.f32 %v963_v56, %v867_v50  ;;  %v554_v59 = vpop.f32.mrb[7].mxu0 }
 0x2e6   :  { %v555_v60 = vadd.f32 %v867_v50, %v554_v59  ;;  %970 = vmatprep.mubr.msk.f32.mxu0 %vm173_vm1, %v563_v55 }
 0x2e7   :  { %971 = vmatmul.mubr.msk.f32.vlgmr.msra.gmra.mrb[8].mxu0 %vm173_vm1, %v564_v57  ;;  %v566_v62 = vmax.f32 %v560_v58, 0.0 }
 0x2e8   :  { %v565_v61 = vmax.f32 %v555_v60, 0.0 }
 0x2ea   :  { %973 = vmatprep.mubr.msk.f32.mxu1 %vm173_vm1, %v565_v61 }
 0x2eb   :  { %974 = vmatmul.mubr.msk.f32.vlgmr.msra.gmra.mrb[8].mxu1 %vm173_vm1, %v566_v62 }
 0x3ba   :  { %v972_v0 = vpop.f32.mrb[8].mxu0 }
 0x3bb   :  { %v655_v3 = vadd.f32 %v972_v0, %v872_v63  ;;  %v649_v4 = vpop.f32.mrb[9].mxu0 }
 0x3bc   :  { %v650_v6 = vadd.f32 %v872_v63, %v649_v4 }
 0x3bd   :  { %v878_v1 = vmul.f32 -1.442695, %v655_v3 }
 0x3be   :  { %v877_v2 = vmul.f32 -1.442695, %v650_v6  ;;  %v975_v10 = vpop.f32.mrb[8].mxu1 }
 0x3bf   :  { %1030 = vpow2.f32 %v878_v1  ;;  %v665_v11 = vadd.f32 %v975_v10, %v872_v63  ;;  %v659_v12 = vpop.f32.mrb[9].mxu1 }
 0x3c0   :  { %1032 = vpow2.f32 %v877_v2  ;;  %v660_v15 = vadd.f32 %v872_v63, %v659_v12 }
 0x3c1   :  { %v880_v16 = vmul.f32 -1.442695, %v665_v11 }
 0x3c2   :  { %v879_v17 = vmul.f32 -1.442695, %v660_v15 }
 0x3c3   :  { %1034 = vpow2.f32 %v880_v16 }
 0x3c4   :  { %1036 = vpow2.f32 %v879_v17 }
 0x3c9   :  { %v1031_v18 = vpop.eup %1030 }
 0x3ca   :  { %v1033_v19 = vpop.eup %1032  ;;  %v681_v20 = vadd.f32 1.0, %v1031_v18 }
 0x3cb   :  { %v680_v21 = vadd.f32 1.0, %v1033_v19 }
 0x3cc   :  { %1038 = vrcp.f32 %v681_v20 }
 0x3cd   :  { %v1035_v22 = vpop.eup %1034  ;;  %1040 = vrcp.f32 %v680_v21 }
 0x3ce   :  { %v1037_v13 = vpop.eup %1036  ;;  %v683_v14 = vadd.f32 1.0, %v1035_v22 }
 0x3cf   :  { %v682_v23 = vadd.f32 1.0, %v1037_v13 }
 0x3d0   :  { %1042 = vrcp.f32 %v683_v14 }
 0x3d1   :  { %1044 = vrcp.f32 %v682_v23 }
 0x3d6   :  { %v1039_v26 = vpop.eup %1038 }
 0x3d7   :  { %v1041_v27 = vpop.eup %1040  ;;  %v693_v29 = vsub.f32 %v1039_v26, %v1196_v7  ;;  %v765_v7 = vmul.f32 -0.5, %v761_v36 }
 0x3d8   :  { %v692_v30 = vsub.f32 %v1041_v27, %v1189_v5 }
 0x3d9   :  { %v697_v31 = vmul.f32 %v693_v29, %v693_v29  ;;  %v783_v50 = vsel %vm766_vm3, %v765_v7, 0.0 }
 0x3da   :  { %v1043_v32 = vpop.eup %1042  ;;  %v696_v34 = vmul.f32 %v692_v30, %v692_v30 }
 0x3db   :  { %v1045_v35 = vpop.eup %1044  ;;  %v701_v37 = vsel %vm67_vm0, %v697_v31, 0.0  ;;  %v695_v38 = vsub.f32 %v1043_v32, %v1210_v9  ;;  %v769_v9 = vadd.f32 %v768_v44, %v767_v48 }
 0x3dc   :  { %v700_v40 = vsel %vm67_vm0, %v696_v34, 0.0  ;;  %v694_v41 = vsub.f32 %v1045_v35, %v1201_v8  ;;  %v784_v8 = vadd.f32 %v783_v50, %v782_v51 }
 0x3dd   :  { %v702_v42 = vadd.f32 %v701_v37, %v700_v40  ;;  %v699_v43 = vmul.f32 %v695_v38, %v695_v38 }
 0x3de   :  { %v698_v5 = vmul.f32 %v694_v41, %v694_v41 }
 0x3df   :  { %703 = vadd.xlane.f32.xlu0 %v702_v42  ;;  %v716_v45 = vsel %vm67_vm0, %v699_v43, 0.0 }
 0x3e0   :  { %v715_v47 = vsel %vm67_vm0, %v698_v5, 0.0 }
 0x3e1   :  { %v717_v49 = vadd.f32 %v716_v45, %v715_v47 }
 0x3e3   :  { %718 = vadd.xlane.f32.xlu1 %v717_v49  ;;  %770 = vadd.xlane.f32.xlu0 %v769_v9 }
 0x3e7   :  { %785 = vadd.xlane.f32.xlu1 %v784_v8 }
 0x3e8   :  { %1079 = shalt.err (!%p1076_p12)
}
 0x3e9   :  { %s1080_s30 = scalar_lea.hbm %s1319_s4, 256 }
 0x3ea   :  { %p1081_p13 = scmp.ne.s32.totalorder %s1319_s4, %s1080_s30  ;;  %p1084_p0 = scmp.lt.u32.totalorder %s1080_s30, %s1319_s4 }
 0x3ec   :  { %p1086_p1 = pnand %p1084_p0, %p1081_p13 }
 0x3ee   :  { %1089 = shalt.err (!%p1086_p1)
}
 0x3ef   :  { %815 = dma.vmem_to_hbm [thread:$0]  %s810_s24, 256, %s1319_s4, [#allocation4], %s1131_s7, %s1131_s7, %s1132_s8  }
 0x3f0   :  { %s1090_s14 = scalar_lea.vmem %s1266_s26, 256  ;;  %p1095_p3 = scmp.lt.s32.totalorder %s1266_s26, %s1266_s26 }
 0x3f1   :  { %p1091_p2 = scmp.ne.s32.totalorder %s1266_s26, %s1090_s14  ;;  %p1096_p4 = scmp.lt.s32.totalorder %s1090_s14, %s1090_s14 }
 0x3f3   :  { %p1097_p5 = por %p1096_p4, %p1095_p3 }
 0x3f5   :  { %p1098_p6 = pnand %p1097_p5, %p1091_p2 }
 0x3f7   :  { %1101 = shalt.err (!%p1098_p6)
}
 0x3f8   :  { %s1102_s17 = scalar_lea.hbm %s1320_s5, 256 }
 0x3f9   :  { %p1103_p7 = scmp.ne.s32.totalorder %s1320_s5, %s1102_s17  ;;  %p1106_p8 = scmp.lt.u32.totalorder %s1102_s17, %s1320_s5 }
 0x3fb   :  { %p1108_p9 = pnand %p1106_p8, %p1103_p7 }
 0x3fd   :  { %1111 = shalt.err (!%p1108_p9)
}
 0x3fe   :  { %827 = dma.vmem_to_hbm [thread:$0]  %s1266_s26, 256, %s1320_s5, [#allocation8], %s1131_s7, %s1131_s7, %s1132_s8  }
 0x3ff   :  { %s1112_s10 = scalar_lea.hbm %s1321_s6, 16 }
 0x400   :  { %p1113_p10 = scmp.ne.s32.totalorder %s1321_s6, %s1112_s10  ;;  %p1116_p11 = scmp.lt.u32.totalorder %s1112_s10, %s1321_s6 }
 0x402   :  { %p1118_p12 = pnand %p1116_p11, %p1113_p10 }
 0x46c   :  { %v704_v52 = vpop.xlane.xlu0 %703 }
 0x46d   :  { %v705_v53 = vrot.slane %v704_v52, 4 }
 0x46f   :  { %v706_v54 = vadd.f32 %v705_v53, %v704_v52 }
 0x470   :  { %v719_v55 = vpop.xlane.xlu1 %718  ;;  %v771_v56 = vpop.xlane.xlu0 %770 }
 0x471   :  { %v707_v57 = vrot.slane %v706_v54, 2  ;;  %v720_v58 = vrot.slane %v719_v55, 4  ;;  %v772_v59 = vrot.slane %v771_v56, 4 }
 0x473   :  { %v721_v60 = vadd.f32 %v720_v58, %v719_v55  ;;  %v773_v61 = vadd.f32 %v772_v59, %v771_v56  ;;  %v708_v62 = vadd.f32 %v707_v57, %v706_v54 }
 0x474   :  { %v786_v63 = vpop.xlane.xlu1 %785 }
 0x475   :  { %v722_v0 = vrot.slane %v721_v60, 2  ;;  %v774_v3 = vrot.slane %v773_v61, 2  ;;  %v787_v4 = vrot.slane %v786_v63, 4  ;;  %v709_v6 = vrot.slane %v708_v62, 1 }
 0x477   :  { %v775_v1 = vadd.f32 %v774_v3, %v773_v61  ;;  %v788_v2 = vadd.f32 %v787_v4, %v786_v63  ;;  %v710_v10 = vadd.f32 %v709_v6, %v708_v62  ;;  %v723_v11 = vadd.f32 %v722_v0, %v721_v60 }
 0x479   :  { %v789_v12 = vrot.slane %v788_v2, 2  ;;  %1004 = vpush %v710_v10  ;;  %v724_v15 = vrot.slane %v723_v11, 1  ;;  %v776_v16 = vrot.slane %v775_v1, 1 }
 0x47b   :  { %v790_v17 = vadd.f32 %v789_v12, %v788_v2  ;;  %v725_v18 = vadd.f32 %v724_v15, %v723_v11  ;;  %v777_v19 = vadd.f32 %v776_v16, %v775_v1 }
 0x47d   :  { %1006 = vpush %v725_v18  ;;  %v791_v20 = vrot.slane %v790_v17, 1 }
 0x47e   :  { %1008 = vpush %v777_v19 }
 0x47f   :  { %v792_v21 = vadd.f32 %v791_v20, %v790_v17 }
 0x481   :  { %1010 = vpush %v792_v21 }
 0x4aa   :  { %s1005_s5 = spop %1004 }
 0x4ab   :  { %s714_s8 = smul.f32 0.001953125, %s1005_s5 }
 0x4ae   :  { %s1007_s7 = spop %1006 }
 0x4af   :  { %s1009_s21 = spop %1008  ;;  %s729_s23 = smul.f32 0.001953125, %s1007_s7 }
 0x4b0   :  { %s781_s22 = smul.f32 0.0625, %s1009_s21 }
 0x4b2   :  { %s797_s2 = sadd.f32 %s781_s22, %s714_s8  ;;  %s1011_s24 = spop %1010 }
 0x4b3   :  { %s796_s25 = smul.f32 0.0625, %s1011_s24 }
 0x4b4   :  { %s798_s27 = smul.f32 0.5, %s797_s2 }
 0x4b5   :  { %s799_s26 = sadd.f32 %s796_s25, %s729_s23 }
 0x4b7   :  { %s800_s28 = smul.f32 0.5, %s799_s26 }
 0x4b9   :  { %s801_s29 = sadd.f32 %s800_s28, %s798_s27 }
 0x4bb   :  { %803 = sst [smem:[#allocation9]] %s801_s29 }
 0x4bc   :  { %1121 = shalt.err (!%p1118_p12)
}
 0x4bd   :  { %s1135_s14 = smov [#allocation9]  }
 0x4be   :  { %835 = dma.smem_to_hbm %s1135_s14, 16, %s1321_s6, [#allocation5]  }
 0x4bf   :  { %1124 = dma.done.wait [#allocation4], 256  }
 0x4c0   :  { %1125 = vsyncadd [#allocation4], 4294967040 }
 0x4c1   :  { %1126 = dma.done.wait [#allocation8], 256  }
 0x4c2   :  { %1127 = vsyncadd [#allocation8], 4294967040 }
 0x4c3   :  { %1128 = dma.done.wait [#allocation5], 16  }
 0x4c4   :  { %1129 = vsyncadd [#allocation5], 4294967280 }
 0x4c5   :  { %845 = sfence }
 0x4c6   :  { %846 = vsyncpa [#allocation3], 1 }
 0x4c7   :  { %847 = vsyncpa [#allocation4], 1 }
 0x4c8   :  { %848 = vsyncpa [#allocation8], 1 }
 0x4c9   :  { %849 = vsyncpa [#allocation5], 1 }

</bundles_post_ra>
